<compile_context>
chip_gen: v5e
topology: v5e:2x2
jax: 0.10.0
libtpu: 0.0.40
codegen_flags: <defaults>
</compile_context>

<pallas_src>
import math
import functools

import numpy as np
import jax
import jax.numpy as jnp
from jax import lax
from jax.experimental import pallas as pl
from jax.experimental.pallas import tpu as pltpu


# ----------------------------------------------------------------------------
# Hardware budget & pltpu.roll direction probe (both cached per process)
# ----------------------------------------------------------------------------
@functools.lru_cache(maxsize=1)
def _vmem_limit_bytes():
    """~75% of this generation's physical VMEM (v5e/v6e: 128 MiB, v7x: 64 MiB)."""
    try:
        cap = int(pltpu.get_tpu_info().vmem_capacity_bytes)
    except Exception:
        cap = 64 * 1024 * 1024
    return max(32 * 1024 * 1024, (cap * 3) // 4)


def _probe_roll_kernel(x_ref, o_ref):
    o_ref[...] = pltpu.roll(x_ref[...], 5, axis=1)


@functools.lru_cache(maxsize=1)
def _roll_sign():
    """Pin down which sign of `shift` delivers out[p] = in[p + d]."""
    x = lax.broadcasted_iota(jnp.float32, (8, 128), 1)
    y = pl.pallas_call(
        _probe_roll_kernel,
        out_shape=jax.ShapeDtypeStruct((8, 128), jnp.float32),
    )(x)
    if bool(jnp.all(y == jnp.roll(x, 5, axis=1))):
        return -1          # np.roll convention: out[i] = in[i - shift]
    if bool(jnp.all(y == jnp.roll(x, -5, axis=1))):
        return 1           # opposite convention: out[i] = in[i + shift]
    raise RuntimeError("unrecognized pltpu.roll semantics")


_TAPS = [(dh, dw) for dh in (-1, 0, 1) for dw in (-1, 0, 1)]   # tap k = kh*3+kw


def _boundary_masks(H, W):
    """(9, H*W) {0,1} bf16 validity masks, one per 3x3 tap (host-side, so the
    kernel has no integer div/mod VPU sequences)."""
    ph, pw = np.meshgrid(np.arange(H), np.arange(W), indexing="ij")
    ph, pw = ph.reshape(-1), pw.reshape(-1)
    ms = []
    for dh, dw in _TAPS:
        ms.append((ph + dh >= 0) & (ph + dh < H) & (pw + dw >= 0) & (pw + dw < W))
    return jnp.asarray(np.stack(ms).astype(np.float32)).astype(jnp.bfloat16)


def _bcast_spec(shape):
    """BlockSpec for a small array broadcast to every grid step."""
    zeros = (0,) * len(shape)
    return pl.BlockSpec(shape, lambda n, _z=zeros: _z)


# ----------------------------------------------------------------------------
# MCnet (JAX/Pallas) -- mirrors MCnet.__init__ block parsing + forward loop
# ----------------------------------------------------------------------------
class MCnetPallas:
    NA = 3   # anchors per level
    NC = 1   # classes (self.nc = 1 in MCnet)

    def __init__(self, block_cfg, key):
        self.det_out_idx = block_cfg[0][0]
        self.seg_out_idx = list(block_cfg[0][1:])
        self._roll_sign = _roll_sign()
        self.blocks, save = [], []
        keys = jax.random.split(key, len(block_cfg) - 1)
        for i, (from_, btype, args) in enumerate(block_cfg[1:]):
            params = self._build_block(btype, args, keys[i])
            self.blocks.append(dict(index=i, from_=from_, type=btype,
                                    act=args[-1] if btype == "ConvBnAct" else None,
                                    **params))
            save.extend(x % i for x in
                        ([from_] if isinstance(from_, int) else from_)
                        if x != -1)
        self.save = sorted(set(save))
        assert self.blocks[self.det_out_idx]["type"] == "Detect"
        # All synthetic blocks are stride-1, so the dummy 128x128 forward in
        # MCnet.__init__ would yield stride = 128 / 128 = 1.
        # TODO(synk): anchor scaling / check_anchor_order is init-time anchor
        # bookkeeping only; the training-mode forward never reads anchors.
        self.stride = 1.0
        self._initialize_biases()
        self._fuse_seg_heads()
        self._build_plan()

    # ------------------------------------------------------------------ build
    def _build_block(self, btype, args, key):
        k = jax.random.split(key, 4)
        if btype == "ConvBnAct":
            cin, cout, _act = args
            w = 0.1 * jax.random.normal(k[0], (3, 3, cin, cout), jnp.float32)
            gamma = 1.0 + 0.05 * jax.random.normal(k[1], (cout,), jnp.float32)
            beta = 0.05 * jax.random.normal(k[2], (cout,), jnp.float32)
            rmean = 0.05 * jax.random.normal(k[3], (cout,), jnp.float32)
            rvar = jnp.ones((cout,), jnp.float32)
            eps = 1e-3            # initialize_weights sets BatchNorm eps = 0.001
            scale = gamma / jnp.sqrt(rvar + eps)
            bias = beta - rmean * scale
            wf = w * scale                              # fold BN scale into conv
            w9 = wf.reshape(9, cin, cout)               # tap-major (kh*3 + kw)
            # Per-conv strategy / weight layout:
            #  * Cout < Cin            -> per-tap (9, Cout, Cin); roll/mask the
            #    small f32 output (v5e-friendly; used by the fused seg heads).
            #  * Cin % 8 == 0          -> stacked (Cout, 9*Cin); one MXU matmul
            #    over a scratch-assembled (9*Cin, HW) bf16 input.
            #  * otherwise             -> per-tap (9, Cout, Cin); roll/mask the
            #    bf16 input.
            if cout >= cin and cin % 8 == 0:
                layout = "stacked"
                wk = jnp.transpose(w9, (2, 0, 1)).reshape(cout, 9 * cin)
            else:
                layout = "per_tap"
                wk = jnp.transpose(w9, (0, 2, 1))       # (9, Cout, Cin)
            w_oihw = jnp.transpose(wf, (3, 2, 0, 1))    # (Cout, Cin, 3, 3) for ref
            return dict(wk=wk.astype(jnp.bfloat16),
                        w_ref=w_oihw.astype(jnp.bfloat16),
                        bias=bias.astype(jnp.float32),
                        cin=cin, cout=cout, layout=layout)
        elif btype == "Detect":
            nc, cin = args
            no = nc + 5
            cout = self.NA * no
            w = 0.1 * jax.random.normal(k[0], (cout, cin), jnp.float32)
            b = 0.01 * jax.random.normal(k[1], (cout,), jnp.float32)
            return dict(w=w.astype(jnp.bfloat16), bias=b.astype(jnp.float32),
                        nc=nc, no=no, cin=cin, cout=cout)
        raise ValueError(f"unsupported block type {btype}")

    def _initialize_biases(self):
        m = self.blocks[self.det_out_idx]
        b = m["bias"].reshape(self.NA, m["no"])
        b = b.at[:, 4].add(math.log(8.0 / (640.0 / self.stride) ** 2))
        b = b.at[:, 5:].add(math.log(0.6 / (self.NC - 0.99)))
        m["bias"] = b.reshape(-1)

    def _fuse_seg_heads(self):
        """The two seg heads share the same input and 3x3+sigmoid structure, so
        fuse them into a single Cout=2 conv inside the kernel (halves reads of
        the shared activation and one fewer conv body)."""
        si = self.seg_out_idx
        self.fuse_seg = (
            len(si) == 2
            and all(self.blocks[j]["type"] == "ConvBnAct" for j in si)
            and self.blocks[si[0]]["from_"] == self.blocks[si[1]]["from_"]
            and self.blocks[si[0]]["act"] == self.blocks[si[1]]["act"]
            and self.blocks[si[0]]["layout"] == "per_tap"
            and self.blocks[si[1]]["layout"] == "per_tap"
            and self.blocks[si[0]]["cin"] == self.blocks[si[1]]["cin"])
        if self.fuse_seg:
            h0, h1 = (self.blocks[j] for j in si)
            self.seg_wk = jnp.concatenate([h0["wk"], h1["wk"]], axis=1)  # (9,2,Cin)
            self.seg_bias = jnp.concatenate([h0["bias"], h1["bias"]], axis=0)

    def _build_plan(self):
        """Flat kernel-operand plan: refs = [mask, x, (w,b) per executed conv,
        outputs..., optional stacked-K scratch]."""
        self._weights, self._wpos = [], {}
        pos = 2                                      # refs[0]=mask, refs[1]=x
        for i, blk in enumerate(self.blocks):
            if self.fuse_seg and i in self.seg_out_idx:
                if i == self.seg_out_idx[0]:
                    self._weights += [self.seg_wk, self.seg_bias.reshape(-1, 1)]
                    self._wpos[i] = pos
                    pos += 2
                continue
            if blk["type"] == "ConvBnAct":
                self._weights += [blk["wk"], blk["bias"].reshape(-1, 1)]
            else:                                    # Detect 1x1 head
                self._weights += [blk["w"], blk["bias"].reshape(-1, 1)]
            self._wpos[i] = pos
            pos += 2
        self._n_in = pos
        # Output plan: slot 0 = raw Detect conv (f32), then seg head(s) (bf16).
        det_cout = self.blocks[self.det_out_idx]["cout"]
        self._out_meta = [("det", det_cout, jnp.float32)]
        self._out_slot = {"det": 0}
        if self.fuse_seg:
            nseg = sum(self.blocks[j]["cout"] for j in self.seg_out_idx)
            self._out_slot["seg"] = 1
            self._out_meta.append(("seg", nseg, jnp.bfloat16))
        else:
            for j in self.seg_out_idx:
                self._out_slot[("seg", j)] = len(self._out_meta)
                self._out_meta.append((("seg", j), self.blocks[j]["cout"],
                                       jnp.bfloat16))
        # Channel offsets of each head inside the fused seg output.
        self._seg_ch_off, off = {}, 0
        for j in self.seg_out_idx:
            self._seg_ch_off[j] = off
            off += self.blocks[j]["cout"]
        # Scratch rows for the stacked-K path (0 if no stacked conv).
        self._stk_rows = max([9 * blk["cin"] for blk in self.blocks
                              if blk["type"] == "ConvBnAct"
                              and blk["layout"] == "stacked"] or [0])

    # ----------------------------------------------------------------- kernel
    def _make_kernel(self, H, W):
        HW = H * W
        rs = self._roll_sign
        blocks = self.blocks
        seg_idx = self.seg_out_idx
        fuse = self.fuse_seg
        wpos = self._wpos
        save = set(self.save)
        out_slot = self._out_slot
        seg_ch_off = self._seg_ch_off
        n_in, n_out = self._n_in, len(self._out_meta)
        has_stk = self._stk_rows > 0

        def conv3x3(x, w_ref, b_ref, mask, act, stk_ref):
            """3x3 'same' conv + folded-BN bias + act on one (Cin, HW) bf16 tile.
            Returns (Cout, HW) f32."""
            Cin = x.shape[0]
            if len(w_ref.shape) == 2:
                # Stacked-K: assemble (9*Cin, HW) bf16 in scratch, one matmul.
                for k, (dh, dw) in enumerate(_TAPS):
                    d = dh * W + dw
                    xs = x if d == 0 else (
                        pltpu.roll(x, (rs * d) % HW, axis=1) * mask[k:k + 1])
                    stk_ref[k * Cin:(k + 1) * Cin, :] = xs
                acc = jnp.dot(w_ref[...], stk_ref[0:9 * Cin, :],
                              preferred_element_type=jnp.float32)
            else:
                Cout = w_ref.shape[1]
                acc = None
                for k, (dh, dw) in enumerate(_TAPS):
                    d = dh * W + dw
                    if Cout < Cin:
                        # Roll/mask the small f32 output side (v5e-friendly).
                        z = jnp.dot(w_ref[k], x,
                                    preferred_element_type=jnp.float32)
                        if d != 0:
                            z = (pltpu.roll(z, (rs * d) % HW, axis=1)
                                 * mask[k:k + 1].astype(jnp.float32))
                    else:
                        # Roll/mask the bf16 input side.
                        xs = x if d == 0 else (
                            pltpu.roll(x, (rs * d) % HW, axis=1)
                            * mask[k:k + 1])
                        z = jnp.dot(w_ref[k], xs,
                                    preferred_element_type=jnp.float32)
                    acc = z if acc is None else acc + z
            y = acc + b_ref[...]                            # f32 epilogue
            if act == "relu":
                y = jnp.maximum(y, 0.0)
            elif act == "sigmoid":
                y = jax.nn.sigmoid(y)
            return y

        def kernel(*refs):
            mask = refs[0][...]                             # (9, HW) bf16
            x = refs[1][0]                                  # (Cin0, HW) bf16
            outs = refs[n_in:n_in + n_out]
            stk_ref = refs[n_in + n_out] if has_stk else None
            cache, seg_pre = [], None
            for i, blk in enumerate(blocks):
                f = blk["from_"]
                if f != -1:
                    if not isinstance(f, int):
                        # TODO(synk): list-valued from_ (Concat routing) is not
                        # implemented in the fused kernel.
                        raise NotImplementedError("list from_ not supported")
                    x = cache[f]
                if blk["type"] == "ConvBnAct":
                    if fuse and i in seg_idx:
                        if seg_pre is None:     # one fused Cout=2 conv
                            w_ref = refs[wpos[seg_idx[0]]]
                            b_ref = refs[wpos[seg_idx[0]] + 1]
                            seg_pre = conv3x3(x, w_ref, b_ref, mask,
                                              blk["act"], stk_ref)
                            oref = outs[out_slot["seg"]]
                            oref[0] = jax.nn.sigmoid(seg_pre).astype(oref.dtype)
                        off, co = seg_ch_off[i], blk["cout"]
                        x = seg_pre[off:off + co].astype(jnp.bfloat16)
                    else:
                        w_ref, b_ref = refs[wpos[i]], refs[wpos[i] + 1]
                        y = conv3x3(x, w_ref, b_ref, mask, blk["act"], stk_ref)
                        if i in seg_idx:        # forward-loop nn.Sigmoid, fused
                            oref = outs[out_slot[("seg", i)]]
                            oref[0] = jax.nn.sigmoid(y).astype(oref.dtype)
                        x = y.astype(jnp.bfloat16)
                else:                           # Detect head: 1x1 conv + bias
                    w_ref, b_ref = refs[wpos[i]], refs[wpos[i] + 1]
                    y = jnp.dot(w_ref[...], x,
                                preferred_element_type=jnp.float32) + b_ref[...]
                    oref = outs[out_slot["det"]]
                    oref[0] = y.astype(oref.dtype)
                    x = y
                cache.append(x if i in save else None)

        return kernel

    # ---------------------------------------------------------------- forward
    def forward(self, x_nchw):
        N, C, H, W = x_nchw.shape
        HW = H * W
        xf = x_nchw.reshape(N, C, HW).astype(jnp.bfloat16)
        mask9 = _boundary_masks(H, W)
        kernel = self._make_kernel(H, W)
        in_arrays = [mask9, xf] + self._weights
        in_specs = ([_bcast_spec(mask9.shape),
                     pl.BlockSpec((1, C, HW), lambda n: (n, 0, 0))]
                    + [_bcast_spec(w.shape) for w in self._weights])
        out_shape = tuple(jax.ShapeDtypeStruct((N, c, HW), dt)
                          for (_nm, c, dt) in self._out_meta)
        out_specs = tuple(pl.BlockSpec((1, c, HW), lambda n: (n, 0, 0))
                          for (_nm, c, dt) in self._out_meta)
        scratch = ([pltpu.VMEM((self._stk_rows, HW), jnp.bfloat16)]
                   if self._stk_rows else [])
        results = pl.pallas_call(
            kernel,
            out_shape=out_shape,
            grid=(N,),
            in_specs=in_specs,
            out_specs=out_specs,
            scratch_shapes=scratch,
            compiler_params=pltpu.CompilerParams(
                dimension_semantics=("parallel",),
                vmem_limit_bytes=_vmem_limit_bytes()),
        )(*in_arrays)
        # TODO(synk): at real MCnet resolutions (e.g. 640x384) add a spatial
        # row-tile grid axis ("parallel", with manual halo DMA between conv
        # layers) so blocks fit the per-generation VMEM budget (64 MiB on v7x),
        # the pipeline overlaps DMA with compute, and v7x's second TensorCore
        # stays busy at N=1.
        det_blk = self.blocks[self.det_out_idx]
        det = results[self._out_slot["det"]].reshape(
            N, self.NA, det_blk["no"], H, W)
        det_out = [jnp.transpose(det, (0, 1, 3, 4, 2))]      # (N, na, ny, nx, no)
        segs = []
        if self.fuse_seg:
            seg = results[self._out_slot["seg"]].astype(jnp.float32)
            seg = seg.reshape(N, -1, H, W)
            for i in sorted(self.seg_out_idx):
                off = self._seg_ch_off[i]
                segs.append(seg[:, off:off + self.blocks[i]["cout"]])
        else:
            for i in sorted(self.seg_out_idx):
                segs.append(results[self._out_slot[("seg", i)]]
                            .astype(jnp.float32).reshape(N, -1, H, W))
        return [det_out] + segs


# ----------------------------------------------------------------------------
# Pure-JAX reference (unfused, per-block loop) for verification
# ----------------------------------------------------------------------------
def _ref_conv3x3(x, blk):
    xq = x.astype(jnp.bfloat16).astype(jnp.float32)   # same bf16 quantization
    w = blk["w_ref"].astype(jnp.float32)              # (Cout, Cin, 3, 3)
    y = lax.conv_general_dilated(xq, w, (1, 1), "SAME",
                                 dimension_numbers=("NCHW", "OIHW", "NCHW"))
    y = y + blk["bias"].reshape(1, -1, 1, 1)
    if blk["act"] == "relu":
        y = jnp.maximum(y, 0.0)
    return y


def ref_forward(net, x_nchw):
    x = x_nchw.astype(jnp.float32)
    cache, out, det_out = [], [], None
    for i, blk in enumerate(net.blocks):
        f = blk["from_"]
        if f != -1:
            x = cache[f]
        if blk["type"] == "ConvBnAct":
            x = _ref_conv3x3(x, blk)
        else:                                         # Detect (training mode)
            xq = x.astype(jnp.bfloat16).astype(jnp.float32)
            y = jnp.einsum("nchw,oc->nohw", xq, blk["w"].astype(jnp.float32))
            y = y + blk["bias"].reshape(1, -1, 1, 1)
            N, _, ny, nx = y.shape
            y = y.reshape(N, net.NA, blk["no"], ny, nx)
            x = [jnp.transpose(y, (0, 1, 3, 4, 2))]
        if i in net.seg_out_idx:
            # forward-loop nn.Sigmoid; cast through bf16 to mirror the kernel's
            # bf16 seg-output writeback.
            out.append(jax.nn.sigmoid(x).astype(jnp.bfloat16)
                       .astype(jnp.float32))
        if i == net.det_out_idx:
            det_out = x
        cache.append(x if i in net.save else None)
    out.insert(0, det_out)
    return out


# ----------------------------------------------------------------------------
if __name__ == "__main__":
    # Synthetic block_cfg in MCnet's format: header = [detect_idx, *seg_idxs]
    block_cfg = [
        [2, 3, 4],
        [-1, "ConvBnAct", [3, 8, "relu"]],    # 0: backbone conv (per-tap path)
        [-1, "ConvBnAct", [8, 16, "relu"]],   # 1: backbone conv (stacked-K path)
        [-1, "Detect", [1, 16]],              # 2: detect head (nc=1, cin=16)
        [0, "ConvBnAct", [8, 1, "none"]],     # 3: drivable-area seg head
        [0, "ConvBnAct", [8, 1, "none"]],     # 4: lane-line seg head
    ]

    key = jax.random.PRNGKey(0)
    kp, kx = jax.random.split(key)
    net = MCnetPallas(block_cfg, kp)

    x = jax.random.normal(kx, (2, 3, 16, 16), jnp.float32)   # NCHW like torch

    outs = jax.block_until_ready(net.forward(x))
    refs = ref_forward(net, x)

    flat_o = jax.tree_util.tree_leaves(outs)
    flat_r = jax.tree_util.tree_leaves(refs)
    assert len(flat_o) == len(flat_r) == 3
    assert flat_o[0].shape == (2, 3, 16, 16, 6)                  # detect output
    assert flat_o[1].shape == flat_o[2].shape == (2, 1, 16, 16)  # seg heads
    # Tolerance covers bf16 operand / intermediate-activation / seg-output
    # quantization (accumulation stays f32 in both kernel and reference).
    for o, r in zip(flat_o, flat_r):
        assert o.shape == r.shape
        err = float(jnp.max(jnp.abs(o.astype(jnp.float32)
                                    - r.astype(jnp.float32))))
        assert err < 1e-2, f"mismatch: max abs err {err}"

    print("KERNEL_OK")
</pallas_src>

<mosaic_0001>
module attributes {stable_mosaic.version = 11 : i64} {
  func.func @_probe_roll_kernel(%arg0: memref<8x128xf32, #tpu.memory_space<vmem>>, %arg1: memref<8x128xf32, #tpu.memory_space<vmem>>) attributes {dimension_semantics = [], scalar_prefetch = 0 : i64, scratch_operands = 0 : i64, tpu.core_type = #tpu.core_type<tc>} {
    %c0 = arith.constant 0 : index
    %c0_0 = arith.constant 0 : index
    %0 = vector.load %arg0[%c0, %c0_0] : memref<8x128xf32, #tpu.memory_space<vmem>>, vector<8x128xf32>
    %c5_i32 = arith.constant 5 : i32
    %1 = tpu.dynamic_rotate %0 by %c5_i32 dim 1 : vector<8x128xf32>, i32 -> vector<8x128xf32>
    %c0_1 = arith.constant 0 : index
    %c0_2 = arith.constant 0 : index
    %2 = vector.load %arg1[%c0_1, %c0_2] : memref<8x128xf32, #tpu.memory_space<vmem>>, vector<8x128xf32>
    tpu.vector_store %arg1[%c0_1, %c0_2], %1 {strides = array<i32>} : memref<8x128xf32, #tpu.memory_space<vmem>>, vector<8x128xf32>,
    return
  }
}

</mosaic_0001>

<bundles_post_ra>
// kernel: tpu_custom_call.1
= control target key start
LH: loop header
LB: loop body
LE: loop exit
PB: predicated region body
PF: predicated region fallthrough
CT: control target
= control target key end

     0   :  { %6 = vsyncpa [#allocation3], 0  ;;  %s118_s0 = inlined_call_operand.hbm [shape: f32[8,128], index: 0, kind: input, shape index: {}]   ;;  %s119_s1 = inlined_call_operand.hbm [shape: f32[8,128], index: 1, kind: output, shape index: {}]  }
   0x1   :  { %7 = vsyncpa [#allocation4], 0  ;;  %s13_s8 = sshll.u32 %s118_s0, 4  ;;  %s99_s9 = smov [#allocation2]   ;;  %s14_s8 = int_to_ptr.hbm [resolvable:$true] %s13_s8 }
   0x2   :  { %s15_s10 = sshll.u32 %s99_s9, 4  ;;  %s16_s10 = int_to_ptr.vmem [resolvable:$true] %s15_s10 }
   0x3   :  { %18 = dma.hbm_to_vmem [thread:$0]  %s14_s8, 128, %s16_s10, [#allocation3]  }
   0x4   :  { %95 = dma.done.wait [#allocation3], 128  }
   0x5   :  { %96 = vsyncadd [#allocation3], 4294967168  ;;  %v23_v0 = vld [vmem:[#allocation2] sm:$0xff]  ;;  %s100_s11 = smov 5   ;;  %s101_s12 = smov [#allocation5]  }
   0x6   :  { %24 = vrot.lane.b32.xlu0 %v23_v0, %s100_s11  ;;  %s32_s13 = sshll.u32 %s101_s12, 4  ;;  %s34_s16 = sshll.u32 %s119_s1, 4  ;;  %s33_s13 = int_to_ptr.vmem [resolvable:$true] %s32_s13  ;;  %s35_s16 = int_to_ptr.hbm [resolvable:$true] %s34_s16 }
  0x78   :  { %v25_v1 = vpop.permute.xlu0 %24 }
  0x79   :  { %26 = vst [vmem:[#allocation5] sm:$0xff] %v25_v1 }
  0x7a   :  { %37 = dma.vmem_to_hbm [thread:$0]  %s33_s13, 128, %s35_s16, [#allocation4]  }
  0x7b   :  { %97 = dma.done.wait [#allocation4], 128  }
  0x7c   :  { %98 = vsyncadd [#allocation4], 4294967168 }
  0x7d   :  { %42 = vsyncpa [#allocation3], 1 }
  0x7e   :  { %43 = vsyncpa [#allocation4], 1 }

</bundles_post_ra>
